<compile_context>
chip_gen: v5e
topology: v5e:2x2
jax: 0.10.0
libtpu: 0.0.40
codegen_flags: <defaults>
</compile_context>

<pallas_src>
import math
from functools import partial

import jax
import jax.numpy as jnp
from jax.experimental import pallas as pl
from jax.experimental.pallas import tpu as pltpu


# --------------------------------------------------------------------------- #
# Helpers
# --------------------------------------------------------------------------- #
def _round_up(x: int, m: int) -> int:
    return ((x + m - 1) // m) * m


def _pad_lane_dim(d: int) -> int:
    # Lane (last) dims: at least multiples of 128; larger dims are padded to
    # multiples of 256 so the 2x256 MXUs on v6e/v7x are fully fed at the edges.
    return _round_up(d, 128) if d <= 256 else _round_up(d, 256)


def _tpu_vmem_capacity_bytes() -> int:
    try:
        cap = int(pltpu.get_tpu_info().vmem_capacity_bytes)
        if cap > 0:
            return cap
    except Exception:
        pass
    return 64 << 20  # conservative default (v7x per-TensorCore VMEM)


def _apply_activation(h, activation):
    if activation == "relu":
        return jnp.maximum(h, 0.0)
    if activation == "gelu":
        return jax.nn.gelu(h, approximate=False)
    if activation == "tanh":
        return jnp.tanh(h)
    raise ValueError(f"Unknown activation: {activation}")


# --------------------------------------------------------------------------- #
# Kernels
# --------------------------------------------------------------------------- #
def _mlp_fused_kernel(x_ref, w1_ref, b1_ref, w2_ref, b2_ref, o_ref, *, activation):
    # [TB, D_pad](bf16) @ [D_pad, H_pad](bf16) -> f32 accumulation on the MXU.
    h = jnp.dot(x_ref[...], w1_ref[...], preferred_element_type=jnp.float32)
    h = _apply_activation(h + b1_ref[...], activation)
    # (dropout: identity at inference)
    logits = jnp.dot(h.astype(w2_ref.dtype), w2_ref[...],
                     preferred_element_type=jnp.float32)
    o_ref[...] = (logits + b2_ref[...]).astype(o_ref.dtype)


def _mlp_ktiled_kernel(x_ref, w1_ref, b1_ref, w2_ref, b2_ref, o_ref, acc_ref,
                       *, activation):
    # Grid = (batch tiles [parallel], K chunks of input_dim [arbitrary]).
    k = pl.program_id(1)

    @pl.when(k == 0)
    def _():
        acc_ref[...] = jnp.zeros_like(acc_ref)

    acc_ref[...] += jnp.dot(x_ref[...], w1_ref[...],
                            preferred_element_type=jnp.float32)

    @pl.when(k == pl.num_programs(1) - 1)
    def _():
        h = _apply_activation(acc_ref[...] + b1_ref[...], activation)
        logits = jnp.dot(h.astype(w2_ref.dtype), w2_ref[...],
                         preferred_element_type=jnp.float32)
        o_ref[...] = (logits + b2_ref[...]).astype(o_ref.dtype)


# --------------------------------------------------------------------------- #
# Parameter preparation (hoist transpose/pad/cast out of the hot path)
# --------------------------------------------------------------------------- #
def prepare_mlp_params(w1, b1, w2, b2, compute_dtype=jnp.bfloat16):
    """One-time preparation: transpose to [in, out], pad lane dims, cast to bf16.

    Args:
      w1: [hidden_dim, input_dim]   (PyTorch nn.Linear weight layout)
      b1: [hidden_dim]
      w2: [num_classes, hidden_dim]
      b2: [num_classes]
    """
    H, D_in = w1.shape
    C, _ = w2.shape
    D_pad = _pad_lane_dim(D_in)
    H_pad = _pad_lane_dim(H)
    C_pad = _pad_lane_dim(C)

    w1t = jnp.pad(jnp.transpose(w1), ((0, D_pad - D_in), (0, H_pad - H)))
    w2t = jnp.pad(jnp.transpose(w2), ((0, H_pad - H), (0, C_pad - C)))
    return {
        "w1t": w1t.astype(compute_dtype),                              # [D_pad, H_pad]
        "b1": jnp.pad(b1.astype(jnp.float32), (0, H_pad - H)).reshape(1, H_pad),
        "w2t": w2t.astype(compute_dtype),                              # [H_pad, C_pad]
        "b2": jnp.pad(b2.astype(jnp.float32), (0, C_pad - C)).reshape(1, C_pad),
        "input_dim": D_in,
        "hidden_dim": H,
        "num_classes": C,
        "compute_dtype": compute_dtype,
    }


# --------------------------------------------------------------------------- #
# Forward
# --------------------------------------------------------------------------- #
def mlp_classifier_forward_prepared(features, prepared, *, activation="relu",
                                    force_k_tiling=False):
    """Fused MLP classifier forward pass using pre-prepared (padded) params.

    Args:
      features: [B, input_dim]
      prepared: output of prepare_mlp_params
    Returns:
      logits: [B, num_classes]
    """
    B, D_in = features.shape
    assert D_in == prepared["input_dim"], "feature dim mismatch"
    w1t, b1p, w2t, b2p = prepared["w1t"], prepared["b1"], prepared["w2t"], prepared["b2"]
    D_pad, H_pad = w1t.shape
    _, C_pad = w2t.shape
    C = prepared["num_classes"]
    cdtype = prepared["compute_dtype"]
    out_dtype = features.dtype
    cbytes = jnp.dtype(cdtype).itemsize
    out_bytes = jnp.dtype(out_dtype).itemsize

    # ---- per-generation VMEM budget --------------------------------------
    cap = _tpu_vmem_capacity_bytes()                  # 128 MiB v5e/v6e, 64 MiB v7x
    vmem_ceiling = max(32 << 20, min(cap - (16 << 20), 112 << 20))

    # ---- batch tiling ------------------------------------------------------
    B16 = _round_up(B, 16)                            # bf16 sublane packing
    tb_cap = 512 if cap >= (96 << 20) else 256        # bigger tiles when VMEM allows
    TB = min(tb_cap, B16)
    if B16 > 16 and _round_up(B16, TB) // TB < 2:
        # Split into >= 2 batch tiles so the "parallel" axis can shard across
        # both TensorCores on v7x (harmless serial steps on v5e/v6e).
        TB = _round_up(-(-B16 // 2), 16)
    B_pad = _round_up(B16, TB)
    nb = B_pad // TB

    # ---- VMEM need estimates ----------------------------------------------
    bias_bytes = 4 * 8 * (H_pad + C_pad)              # sublane-padded f32 biases
    headroom = 6 << 20                                 # compiler internal scratch etc.

    simple_need = (cbytes * (D_pad * H_pad + H_pad * C_pad)     # resident weights
                   + 2 * TB * D_pad * cbytes                    # double-buffered x
                   + 2 * TB * C_pad * out_bytes                 # double-buffered out
                   + 4 * TB * H_pad                             # f32 intermediate h
                   + bias_bytes + headroom)

    def ktiled_need(tk):
        return (cbytes * (2 * tk * H_pad + H_pad * C_pad)       # w1 blocks + resident w2
                + 2 * TB * tk * cbytes                          # double-buffered x
                + 2 * TB * C_pad * out_bytes                    # double-buffered out
                + 4 * TB * H_pad                                # f32 accumulator scratch
                + bias_bytes + headroom)

    use_ktiled = force_k_tiling or simple_need > vmem_ceiling

    # ---- pad & cast activations (per-call, unavoidable) --------------------
    x_p = jnp.pad(features, ((0, B_pad - B), (0, D_pad - D_in))).astype(cdtype)

    # ---- cost estimate (padded shapes, actual element sizes) ---------------
    flops = 2 * B_pad * (D_pad * H_pad + H_pad * C_pad)
    transcendentals = B_pad * H_pad if activation in ("gelu", "tanh") else 0
    bytes_accessed = (cbytes * (B_pad * D_pad + D_pad * H_pad + H_pad * C_pad)
                      + 4 * (H_pad + C_pad) + out_bytes * B_pad * C_pad)
    cost = pl.CostEstimate(flops=flops, transcendentals=transcendentals,
                           bytes_accessed=bytes_accessed)

    vmem_full = pl.BlockSpec(memory_space=pltpu.MemorySpace.VMEM)

    if not use_ktiled:
        vmem_limit = int(min(max(simple_need, 16 << 20), vmem_ceiling))
        out_padded = pl.pallas_call(
            partial(_mlp_fused_kernel, activation=activation),
            out_shape=jax.ShapeDtypeStruct((B_pad, C_pad), out_dtype),
            grid=(nb,),
            in_specs=[
                pl.BlockSpec((TB, D_pad), lambda i: (i, 0)),   # features tile (bf16)
                vmem_full,                                     # w1^T  [D_pad, H_pad]
                vmem_full,                                     # b1    [1, H_pad] f32
                vmem_full,                                     # w2^T  [H_pad, C_pad]
                vmem_full,                                     # b2    [1, C_pad] f32
            ],
            out_specs=pl.BlockSpec((TB, C_pad), lambda i: (i, 0)),
            compiler_params=pltpu.CompilerParams(
                dimension_semantics=("parallel",),
                vmem_limit_bytes=vmem_limit,
            ),
            cost_estimate=cost,
        )(x_p, w1t, b1p, w2t, b2p)
    else:
        # ---- K-tiled fallback: block w1^T / x over input_dim -----------------
        divisors = [d for d in range(128, D_pad + 1, 128) if D_pad % d == 0]
        divisors.sort(reverse=True)
        if force_k_tiling and len(divisors) > 1:
            candidates = [d for d in divisors if d < D_pad]    # ensure >= 2 K steps
        else:
            candidates = divisors
        TK = candidates[-1]
        for d in candidates:
            if ktiled_need(d) <= vmem_ceiling:
                TK = d
                break
        nk = D_pad // TK
        vmem_limit = int(min(max(ktiled_need(TK), 16 << 20), vmem_ceiling))

        out_padded = pl.pallas_call(
            partial(_mlp_ktiled_kernel, activation=activation),
            out_shape=jax.ShapeDtypeStruct((B_pad, C_pad), out_dtype),
            grid=(nb, nk),
            in_specs=[
                pl.BlockSpec((TB, TK), lambda i, k: (i, k)),       # features tile
                pl.BlockSpec((TK, H_pad), lambda i, k: (k, 0)),    # w1^T K-block
                vmem_full,                                          # b1
                vmem_full,                                          # w2^T (resident)
                vmem_full,                                          # b2
            ],
            out_specs=pl.BlockSpec((TB, C_pad), lambda i, k: (i, 0)),
            scratch_shapes=[pltpu.VMEM((TB, H_pad), jnp.float32)],  # f32 h accumulator
            compiler_params=pltpu.CompilerParams(
                dimension_semantics=("parallel", "arbitrary"),
                vmem_limit_bytes=vmem_limit,
            ),
            cost_estimate=cost,
        )(x_p, w1t, b1p, w2t, b2p)

    return out_padded[:B, :C]


def mlp_classifier_forward(features, w1, b1, w2, b2, *, activation="relu"):
    """Convenience wrapper. For repeated calls, hoist prepare_mlp_params out."""
    prepared = prepare_mlp_params(w1, b1, w2, b2)
    return mlp_classifier_forward_prepared(features, prepared, activation=activation)


# --------------------------------------------------------------------------- #
# Init (matches the PyTorch module's xavier_uniform_ + zero bias)
# --------------------------------------------------------------------------- #
def xavier_uniform(key, out_features, in_features, dtype=jnp.float32):
    bound = math.sqrt(6.0 / (in_features + out_features))
    return jax.random.uniform(
        key, (out_features, in_features), dtype=dtype, minval=-bound, maxval=bound
    )


def init_mlp_classifier(key, input_dim, num_classes, hidden_dims=None,
                        dtype=jnp.float32):
    if hidden_dims is None:
        hidden_dims = [input_dim // 2]
    hidden_dim = hidden_dims[0]
    k1, k2 = jax.random.split(key)
    return {
        "w1": xavier_uniform(k1, hidden_dim, input_dim, dtype),
        "b1": jnp.zeros((hidden_dim,), dtype),
        "w2": xavier_uniform(k2, num_classes, hidden_dim, dtype),
        "b2": jnp.zeros((num_classes,), dtype),
    }


def _reference_forward(features, params, activation="relu", compute_dtype=None):
    """Plain-JAX reference. compute_dtype=bf16 mirrors the kernel's MXU math."""
    w1, b1, w2, b2 = params["w1"], params["b1"], params["w2"], params["b2"]
    if compute_dtype is not None:
        x = features.astype(compute_dtype)
        h = jnp.dot(x, w1.T.astype(compute_dtype),
                    preferred_element_type=jnp.float32) + b1.astype(jnp.float32)
        h = _apply_activation(h, activation)
        logits = jnp.dot(h.astype(compute_dtype), w2.T.astype(compute_dtype),
                         preferred_element_type=jnp.float32) + b2.astype(jnp.float32)
    else:
        h = _apply_activation(features @ w1.T + b1, activation)
        logits = h @ w2.T + b2
    return logits.astype(features.dtype)


if __name__ == "__main__":
    key = jax.random.PRNGKey(0)
    k_p1, k_x1, k_p2, k_x2 = jax.random.split(key, 4)

    # ---- Test 1: default config, simple fused path --------------------------
    batch, input_dim, num_classes = 8, 64, 10          # hidden_dim = 32
    params = init_mlp_classifier(k_p1, input_dim, num_classes)
    prepared = prepare_mlp_params(params["w1"], params["b1"],
                                  params["w2"], params["b2"])
    features = jax.random.normal(k_x1, (batch, input_dim), dtype=jnp.float32)

    logits = mlp_classifier_forward_prepared(features, prepared, activation="relu")
    jax.block_until_ready(logits)

    assert logits.shape == (batch, num_classes)
    ref_bf16 = _reference_forward(features, params, compute_dtype=jnp.bfloat16)
    ref_f32 = _reference_forward(features, params)
    assert jnp.allclose(logits, ref_bf16, atol=5e-3, rtol=5e-3), \
        float(jnp.max(jnp.abs(logits - ref_bf16)))
    assert jnp.allclose(logits, ref_f32, atol=0.25, rtol=0.1)

    # ---- Test 2: force the K-tiled (accumulator) path -----------------------
    batch2, input_dim2, num_classes2 = 24, 200, 7      # hidden_dim = 100
    params2 = init_mlp_classifier(k_p2, input_dim2, num_classes2)
    prepared2 = prepare_mlp_params(params2["w1"], params2["b1"],
                                   params2["w2"], params2["b2"])
    features2 = jax.random.normal(k_x2, (batch2, input_dim2), dtype=jnp.float32)

    logits2 = mlp_classifier_forward_prepared(features2, prepared2,
                                              activation="relu",
                                              force_k_tiling=True)
    jax.block_until_ready(logits2)

    assert logits2.shape == (batch2, num_classes2)
    ref2_bf16 = _reference_forward(features2, params2, compute_dtype=jnp.bfloat16)
    ref2_f32 = _reference_forward(features2, params2)
    assert jnp.allclose(logits2, ref2_bf16, atol=5e-3, rtol=5e-3), \
        float(jnp.max(jnp.abs(logits2 - ref2_bf16)))
    assert jnp.allclose(logits2, ref2_f32, atol=0.3, rtol=0.1)

    print("KERNEL_OK")
</pallas_src>

<mosaic_0001>
module attributes {stable_mosaic.version = 11 : i64} {
  func.func @_mlp_fused_kernel(%arg0: i32, %arg1: memref<16x128xbf16, #tpu.memory_space<vmem>>, %arg2: memref<128x128xbf16, #tpu.memory_space<vmem>>, %arg3: memref<1x128xf32, #tpu.memory_space<vmem>>, %arg4: memref<128x128xbf16, #tpu.memory_space<vmem>>, %arg5: memref<1x128xf32, #tpu.memory_space<vmem>>, %arg6: memref<16x128xf32, #tpu.memory_space<vmem>>) attributes {dimension_semantics = [#tpu.dimension_semantics<parallel>], iteration_bounds = array<i64: 1>, scalar_prefetch = 0 : i64, scratch_operands = 0 : i64, tpu.core_type = #tpu.core_type<tc>, window_params = [{transform_indices = @transform_0, window_bounds = array<i64: 16, 128>}, {pipeline_mode = #tpu.pipeline_mode<synchronous>, transform_indices = @transform_1, window_bounds = array<i64: 128, 128>}, {pipeline_mode = #tpu.pipeline_mode<synchronous>, transform_indices = @transform_2, window_bounds = array<i64: 1, 128>}, {pipeline_mode = #tpu.pipeline_mode<synchronous>, transform_indices = @transform_3, window_bounds = array<i64: 128, 128>}, {pipeline_mode = #tpu.pipeline_mode<synchronous>, transform_indices = @transform_4, window_bounds = array<i64: 1, 128>}, {transform_indices = @transform_5, window_bounds = array<i64: 16, 128>}]} {
    %c0 = arith.constant 0 : index
    %c0_0 = arith.constant 0 : index
    %0 = vector.load %arg1[%c0, %c0_0] : memref<16x128xbf16, #tpu.memory_space<vmem>>, vector<16x128xbf16>
    %c0_1 = arith.constant 0 : index
    %c0_2 = arith.constant 0 : index
    %1 = vector.load %arg2[%c0_1, %c0_2] : memref<128x128xbf16, #tpu.memory_space<vmem>>, vector<128x128xbf16>
    %cst = arith.constant dense<0.000000e+00> : vector<16x128xf32>
    %2 = tpu.matmul %0, %1, %cst {dimension_numbers = #tpu.dot_dimension_numbers<[1], [0], [0], [1], [0, 0, 1, 1], [], []>} : vector<16x128xbf16>, vector<128x128xbf16>, vector<16x128xf32> -> vector<16x128xf32>
    %c0_3 = arith.constant 0 : index
    %c0_4 = arith.constant 0 : index
    %3 = vector.load %arg3[%c0_3, %c0_4] : memref<1x128xf32, #tpu.memory_space<vmem>>, vector<1x128xf32>
    %4 = vector.broadcast %3 : vector<1x128xf32> to vector<16x128xf32>
    %5 = arith.addf %2, %4 : vector<16x128xf32>
    %cst_5 = arith.constant 0.000000e+00 : f32
    %6 = vector.broadcast %cst_5 : f32 to vector<16x128xf32>
    %7 = arith.maximumf %5, %6 : vector<16x128xf32>
    %8 = arith.truncf %7 : vector<16x128xf32> to vector<16x128xbf16>
    %c0_6 = arith.constant 0 : index
    %c0_7 = arith.constant 0 : index
    %9 = vector.load %arg4[%c0_6, %c0_7] : memref<128x128xbf16, #tpu.memory_space<vmem>>, vector<128x128xbf16>
    %cst_8 = arith.constant dense<0.000000e+00> : vector<16x128xf32>
    %10 = tpu.matmul %8, %9, %cst_8 {dimension_numbers = #tpu.dot_dimension_numbers<[1], [0], [0], [1], [0, 0, 1, 1], [], []>} : vector<16x128xbf16>, vector<128x128xbf16>, vector<16x128xf32> -> vector<16x128xf32>
    %c0_9 = arith.constant 0 : index
    %c0_10 = arith.constant 0 : index
    %11 = vector.load %arg5[%c0_9, %c0_10] : memref<1x128xf32, #tpu.memory_space<vmem>>, vector<1x128xf32>
    %12 = vector.broadcast %11 : vector<1x128xf32> to vector<16x128xf32>
    %13 = arith.addf %10, %12 : vector<16x128xf32>
    %c0_11 = arith.constant 0 : index
    %c0_12 = arith.constant 0 : index
    %14 = vector.load %arg6[%c0_11, %c0_12] : memref<16x128xf32, #tpu.memory_space<vmem>>, vector<16x128xf32>
    tpu.vector_store %arg6[%c0_11, %c0_12], %13 {strides = array<i32>} : memref<16x128xf32, #tpu.memory_space<vmem>>, vector<16x128xf32>,
    return
  }
  func.func @transform_0(%arg0: i32) -> (i32, i32) {
    %c0_i32 = arith.constant 0 : i32
    %c0_i32_0 = arith.constant 0 : i32
    return %arg0, %c0_i32 : i32, i32
  }
  func.func @transform_1(%arg0: i32) -> (i32, i32) {
    %c0_i32 = arith.constant 0 : i32
    %c0_i32_0 = arith.constant 0 : i32
    %c0_i32_1 = arith.constant 0 : i32
    return %c0_i32, %c0_i32_0 : i32, i32
  }
  func.func @transform_2(%arg0: i32) -> (i32, i32) {
    %c0_i32 = arith.constant 0 : i32
    %c0_i32_0 = arith.constant 0 : i32
    %c0_i32_1 = arith.constant 0 : i32
    return %c0_i32, %c0_i32_0 : i32, i32
  }
  func.func @transform_3(%arg0: i32) -> (i32, i32) {
    %c0_i32 = arith.constant 0 : i32
    %c0_i32_0 = arith.constant 0 : i32
    %c0_i32_1 = arith.constant 0 : i32
    return %c0_i32, %c0_i32_0 : i32, i32
  }
  func.func @transform_4(%arg0: i32) -> (i32, i32) {
    %c0_i32 = arith.constant 0 : i32
    %c0_i32_0 = arith.constant 0 : i32
    %c0_i32_1 = arith.constant 0 : i32
    return %c0_i32, %c0_i32_0 : i32, i32
  }
  func.func @transform_5(%arg0: i32) -> (i32, i32) {
    %c0_i32 = arith.constant 0 : i32
    %c0_i32_0 = arith.constant 0 : i32
    return %arg0, %c0_i32 : i32, i32
  }
}

</mosaic_0001>

<bundles_post_ra>
// kernel: tpu_custom_call.1
= control target key start
LH: loop header
LB: loop body
LE: loop exit
PB: predicated region body
PF: predicated region fallthrough
CT: control target
= control target key end

     0   :  { %10 = vsyncpa [#allocation3], 0  ;;  %s518_s0 = inlined_call_operand.hbm [shape: bf16[16,128], index: 0, kind: input, shape index: {}]   ;;  %s519_s1 = inlined_call_operand.hbm [shape: bf16[128,128], index: 1, kind: input, shape index: {}]   ;;  %s520_s2 = inlined_call_operand.vmem [shape: f32[1,128], index: 2, kind: input, shape index: {}]   ;;  %s521_s3 = inlined_call_operand.hbm [shape: bf16[128,128], index: 3, kind: input, shape index: {}]   ;;  %s522_s4 = inlined_call_operand.vmem [shape: f32[1,128], index: 4, kind: input, shape index: {}]   ;;  %s523_s5 = inlined_call_operand.hbm [shape: f32[16,128], index: 5, kind: output, shape index: {}]  }
   0x1   :  { %11 = vsyncpa [#allocation6], 0 }
   0x2   :  { %12 = vsyncpa [#allocation4], 0  ;;  %s30_s20 = sshll.u32 %s519_s1, 4  ;;  %s462_s21 = smov [#allocation5]   ;;  %s31_s20 = int_to_ptr.hbm [resolvable:$true] %s30_s20 }
   0x3   :  { %s32_s22 = sshll.u32 %s462_s21, 4  ;;  %s17_s25 = sshll.u32 %s518_s0, 4  ;;  %s33_s22 = int_to_ptr.vmem [resolvable:$true] %s32_s22  ;;  %s18_s25 = int_to_ptr.hbm [resolvable:$true] %s17_s25 }
   0x4   :  { %s463_s26 = smov 64   ;;  %s464_s27 = smov 4  }
   0x5   :  { %38 = dma.hbm_to_vmem [thread:$0]  %s31_s20, 1024, %s33_s22, [#allocation6], %s463_s26, %s463_s26, %s464_s27  }
   0x6   :  { %s465_s28 = smov [#allocation2]   ;;  %s45_s7 = sshll.u32 %s521_s3, 4  ;;  %s46_s7 = int_to_ptr.hbm [resolvable:$true] %s45_s7 }
   0x7   :  { %s19_s29 = sshll.u32 %s465_s28, 4  ;;  %s466_s1 = smov [#allocation7]   ;;  %s20_s29 = int_to_ptr.vmem [resolvable:$true] %s19_s29 }
   0x8   :  { %25 = dma.hbm_to_vmem [thread:$0]  %s18_s25, 128, %s20_s29, [#allocation3], %s463_s26, %s463_s26, %s464_s27  }
   0x9   :  { %s47_s8 = sshll.u32 %s466_s1, 4  ;;  %s48_s8 = int_to_ptr.vmem [resolvable:$true] %s47_s8 }
   0xa   :  { %53 = dma.hbm_to_vmem [thread:$0]  %s46_s7, 1024, %s48_s8, [#allocation6], %s463_s26, %s463_s26, %s464_s27  }
   0xb   :  { %456 = dma.done.wait [#allocation3], 128  }
   0xc   :  { %457 = vsyncadd [#allocation3], 4294967168 }
   0xd   :  { %458 = dma.done.wait [#allocation6], 2048  }
   0xe   :  { %459 = vsyncadd [#allocation6], 4294965248  ;;  %v341_v0 = vld [vmem:[#allocation5 + $0x38] sm:$0xff]  ;;  %v340_v1 = vld [vmem:[#allocation5 + $0x30] sm:$0xff]  ;;  %s467_s11 = smov [#allocation8]   ;;  %s468_s15 = smov 128  }
   0xf   :  { %144 = vmatpush.bf16.msra.mxu0 %v341_v0  ;;  %v349_v2 = vld [vmem:[#allocation7 + $0x38] sm:$0xff]  ;;  %v348_v3 = vld [vmem:[#allocation7 + $0x30] sm:$0xff]  ;;  %v339_v4 = vld [vmem:[#allocation5 + $0x28] sm:$0xff]  ;;  %s249_s12 = sshll.u32 %s467_s11, 4  ;;  %s469_s16 = smov 8   ;;  %s250_s12 = int_to_ptr.vmem [resolvable:$true] %s249_s12 }
  0x10   :  { %229 = vmatpush.bf16.msra.mxu1 %v349_v2  ;;  %v347_v5 = vld [vmem:[#allocation7 + $0x28] sm:$0xff]  ;;  %v338_v6 = vld [vmem:[#allocation5 + $0x20] sm:$0xff]  ;;  %v337_v8 = vld [vmem:[#allocation5 + $0x18] sm:$0xff] }
  0x11   :  { %v346_v7 = vld [vmem:[#allocation7 + $0x20] sm:$0xff]  ;;  %v336_v9 = vld [vmem:[#allocation5 + $0x10] sm:$0xff]  ;;  %v335_v10 = vld [vmem:[#allocation5 + $0x8] sm:$0xff] }
  0x12   :  { %v334_v11 = vld [vmem:[#allocation5] sm:$0xff]  ;;  %v333_v12 = vld [vmem:[#allocation2] sm:$0xff]  ;;  %v344_v14 = vld [vmem:[#allocation7 + $0x10] sm:$0xff] }
  0x13   :  { %145 = vmatpush.bf16.msra.mxu0 %v340_v1  ;;  %v345_v13 = vld [vmem:[#allocation7 + $0x18] sm:$0xff]  ;;  %v343_v15 = vld [vmem:[#allocation7 + $0x8] sm:$0xff]  ;;  %v342_v16 = vld [vmem:[#allocation7] sm:$0xff] }
  0x14   :  { %230 = vmatpush.bf16.msra.mxu1 %v348_v3  ;;  %v358_v18 = vld [vmem:[%s520_s2] ss:$0 sm:$0xff]  ;;  %s251_s2 = sshll.u32 %s523_s5, 4  ;;  %s252_s2 = int_to_ptr.hbm [resolvable:$true] %s251_s2 }
  0x15   :  { %v359_v25 = vld [vmem:[%s522_s4] ss:$0 sm:$0xff] }
  0x17   :  { %146 = vmatpush.bf16.msra.mxu0 %v339_v4 }
  0x18   :  { %231 = vmatpush.bf16.msra.mxu1 %v347_v5 }
  0x1b   :  { %147 = vmatpush.bf16.msra.mxu0 %v338_v6 }
  0x1c   :  { %232 = vmatpush.bf16.msra.mxu1 %v346_v7 }
  0x1f   :  { %148 = vmatpush.bf16.msra.mxu0 %v337_v8 }
  0x20   :  { %233 = vmatpush.bf16.msra.mxu1 %v345_v13 }
  0x23   :  { %149 = vmatpush.bf16.msra.mxu0 %v336_v9 }
  0x24   :  { %234 = vmatpush.bf16.msra.mxu1 %v344_v14 }
  0x27   :  { %150 = vmatpush.bf16.msra.mxu0 %v335_v10 }
  0x28   :  { %235 = vmatpush.bf16.msra.mxu1 %v343_v15 }
  0x2b   :  { %151 = vmatpush.bf16.msra.mxu0 %v334_v11 }
  0x2c   :  { %236 = vmatpush.bf16.msra.mxu1 %v342_v16 }
  0x2e   :  { %152 = vmatmul.bf16.vlgmr.msra.gmra.mxu0 %v333_v12 }
  0xab   :  { %v153_v17 = vpop.f32.mrf.mxu0 }
  0xac   :  { %v154_v19 = vadd.f32 %v358_v18, %v153_v17 }
  0xae   :  { %v158_v22 = vmax.f32 %v154_v19, 0.0 }
  0xb3   :  { %v155_v20 = vpop.f32.mrf.mxu0 }
  0xb4   :  { %v156_v21 = vadd.f32 %v358_v18, %v155_v20 }
  0xb6   :  { %v159_v23 = vmax.f32 %v156_v21, 0.0 }
  0xb8   :  { %v160_v24 = vpack.c.bf16 %v159_v23, %v158_v22 }
  0xba   :  { %237 = vmatmul.bf16.vlgmr.msra.gmra.mxu1 %v160_v24 }
 0x137   :  { %v238_v26 = vpop.f32.mrf.mxu1 }
 0x138   :  { %v239_v27 = vadd.f32 %v359_v25, %v238_v26 }
 0x13a   :  { %243 = vst [vmem:[#allocation8] sm:$0xff] %v239_v27 }
 0x13f   :  { %v240_v28 = vpop.f32.mrf.mxu1 }
 0x140   :  { %v241_v29 = vadd.f32 %v359_v25, %v240_v28 }
 0x142   :  { %244 = vst [vmem:[#allocation8 + $0x8] sm:$0xff] %v241_v29 }
 0x143   :  { %257 = dma.vmem_to_hbm [thread:$0]  %s250_s12, 256, %s252_s2, [#allocation4], %s468_s15, %s468_s15, %s469_s16  }
 0x144   :  { %460 = dma.done.wait [#allocation4], 256  }
 0x145   :  { %461 = vsyncadd [#allocation4], 4294967040 }
 0x146   :  { %262 = vsyncpa [#allocation3], 1 }
 0x147   :  { %263 = vsyncpa [#allocation6], 1 }
 0x148   :  { %264 = vsyncpa [#allocation4], 1 }

</bundles_post_ra>
